<compile_context>
chip_gen: v7x
topology: tpu7x:2x2x1
jax: 0.10.0
libtpu: 0.0.40
codegen_flags: <defaults>
</compile_context>

<pallas_src>
import math

import jax
import jax.numpy as jnp
from jax.experimental import pallas as pl
from jax.experimental.pallas import tpu as pltpu

# ----------------------------- problem sizes ------------------------------
B = 2            # batch
C_IN = 4         # input channels
H = 16           # spatial height
W = 16           # spatial width
F = 32           # backbone feature channels
K = 3            # conv kernel size (same padding = 1)
NUM_CLASSES = 10

KKC = K * K * C_IN          # 36  im2col contraction depth
CPAD = 128                  # lane-dense padded contraction / feature dim
OUT_PAD = 128               # lane-dense padded logits dim
BHW = B * H * W             # 512 rows -> one matmul for the whole batch


# ------------------------------ Pallas kernel -----------------------------
def fused_forward_kernel(p_ref, w_ref, o_ref):
    """Single grid step, all batch elements fused.

    p_ref: (BHW, CPAD)      im2col patches; col KKC is a constant-1 bias column
    w_ref: (2, CPAD, CPAD)  [0] conv weight slab (conv bias + constant feature
                                channel folded in)
                            [1] classifier slab (1/(H*W) mean scale and linear
                                bias folded in)
    o_ref: (B, OUT_PAD)     padded logits; first NUM_CLASSES columns are real
    """
    conv = jnp.dot(p_ref[...], w_ref[0], preferred_element_type=jnp.float32)
    act = jnp.maximum(conv, 0.0)                                  # ReLU
    pooled = jnp.sum(act.reshape(B, H * W, CPAD), axis=1)         # sum pool
    o_ref[...] = jnp.dot(
        pooled, w_ref[1], preferred_element_type=jnp.float32
    ).astype(o_ref.dtype)


# ------------------------------- wrapper -----------------------------------
def pret_torch_nets_forward(x_nchw, params):
    """x_nchw: (B, C_IN, H, W) float32 -> logits (B, NUM_CLASSES)."""
    wconv, bconv, wlin, blin = params

    # ---- im2col in the wrapper (tiny static gather; XLA handles it) ----
    x_nhwc = jnp.transpose(x_nchw, (0, 2, 3, 1))
    pad = K // 2
    x_p = jnp.pad(x_nhwc, ((0, 0), (pad, pad), (pad, pad), (0, 0)))
    shifts = [x_p[:, kh:kh + H, kw:kw + W, :]
              for kh in range(K) for kw in range(K)]
    # (B, H, W, K*K, C_IN) -> (BHW, KKC) in (kh, kw, c) column order
    patches = jnp.stack(shifts, axis=-2).reshape(BHW, KKC)
    patches_aug = jnp.zeros((BHW, CPAD), jnp.float32)
    patches_aug = patches_aug.at[:, :KKC].set(patches)
    patches_aug = patches_aug.at[:, KKC].set(1.0)        # bias column

    # ---- lane-dense weight slabs, biases + mean scale folded in ----
    wc = jnp.zeros((CPAD, CPAD), jnp.float32)
    wc = wc.at[:KKC, :F].set(wconv.reshape(KKC, F))
    wc = wc.at[KKC, :F].set(bconv.reshape(F))            # conv bias
    wc = wc.at[KKC, F].set(1.0)                          # constant channel -> carries linear bias

    inv_hw = 1.0 / float(H * W)
    wl = jnp.zeros((CPAD, OUT_PAD), jnp.float32)
    wl = wl.at[:F, :NUM_CLASSES].set(wlin * inv_hw)      # fold 1/(H*W) mean scale
    wl = wl.at[F, :NUM_CLASSES].set(blin.reshape(NUM_CLASSES) * inv_hw)
    weights = jnp.stack([wc, wl], axis=0)                # one packed slab -> one DMA

    cost = pl.CostEstimate(
        flops=2 * BHW * CPAD * CPAD + 2 * B * CPAD * OUT_PAD,
        transcendentals=0,
        bytes_accessed=(patches_aug.size + weights.size + B * OUT_PAD) * 4,
    )

    out = pl.pallas_call(
        fused_forward_kernel,
        out_shape=jax.ShapeDtypeStruct((B, OUT_PAD), jnp.float32),
        in_specs=[
            pl.BlockSpec(memory_space=pltpu.MemorySpace.VMEM),
            pl.BlockSpec(memory_space=pltpu.MemorySpace.VMEM),
        ],
        out_specs=pl.BlockSpec(memory_space=pltpu.MemorySpace.VMEM),
        cost_estimate=cost,
    )(patches_aug, weights)
    return out[:, :NUM_CLASSES]


# --------------------------- parameter init -------------------------------
def init_params(key):
    k_conv, k_lin = jax.random.split(key, 2)

    # Conv2d: kaiming_uniform_ (a=0 -> gain=sqrt(2)), fan_in = C_IN*K*K
    fan_in_conv = C_IN * K * K
    bound = math.sqrt(6.0 / fan_in_conv)
    wconv = jax.random.uniform(
        k_conv, (K, K, C_IN, F), dtype=jnp.float32, minval=-bound, maxval=bound
    )
    bconv = jnp.zeros((1, F), dtype=jnp.float32)

    # last_linear: kaiming_normal_ (std = sqrt(2/fan_in)), zero bias
    fan_in_lin = F
    std = math.sqrt(2.0 / fan_in_lin)
    wlin = std * jax.random.normal(k_lin, (F, NUM_CLASSES), dtype=jnp.float32)
    blin = jnp.zeros((1, NUM_CLASSES), dtype=jnp.float32)

    return wconv, bconv, wlin, blin


# --------------------------- pure-JAX reference ----------------------------
def reference_forward(x_nchw, params):
    wconv, bconv, wlin, blin = params
    x_nhwc = jnp.transpose(x_nchw, (0, 2, 3, 1))
    y = jax.lax.conv_general_dilated(
        x_nhwc, wconv, window_strides=(1, 1), padding="SAME",
        dimension_numbers=("NHWC", "HWIO", "NHWC"),
    ) + bconv.reshape(1, 1, 1, F)
    y = jnp.maximum(y, 0.0)
    pooled = jnp.mean(y, axis=(1, 2))          # (B, F)
    return pooled @ wlin + blin                # (B, NUM_CLASSES)


# ---------------------------------- main -----------------------------------
if __name__ == "__main__":
    key = jax.random.PRNGKey(0)
    k_x, k_p = jax.random.split(key)

    x = jax.random.normal(k_x, (B, C_IN, H, W), dtype=jnp.float32)
    params = init_params(k_p)

    out = pret_torch_nets_forward(x, params)
    out = jax.block_until_ready(out)

    ref = reference_forward(x, params)
    assert out.shape == (B, NUM_CLASSES)
    assert jnp.allclose(out, ref, atol=1e-4, rtol=1e-4), "mismatch vs reference"

    print("KERNEL_OK")
</pallas_src>

<mosaic_0001>
module attributes {stable_mosaic.version = 11 : i64} {
  func.func @fused_forward_kernel(%arg0: memref<512x128xf32, #tpu.memory_space<vmem>>, %arg1: memref<2x128x128xf32, #tpu.memory_space<vmem>>, %arg2: memref<2x128xf32, #tpu.memory_space<vmem>>) attributes {dimension_semantics = [], scalar_prefetch = 0 : i64, scratch_operands = 0 : i64, tpu.core_type = #tpu.core_type<tc>} {
    %c0 = arith.constant 0 : index
    %c0_0 = arith.constant 0 : index
    %0 = vector.load %arg0[%c0, %c0_0] : memref<512x128xf32, #tpu.memory_space<vmem>>, vector<512x128xf32>
    %c0_1 = arith.constant 0 : index
    %c0_2 = arith.constant 0 : index
    %c0_3 = arith.constant 0 : index
    %1 = vector.load %arg1[%c0_1, %c0_2, %c0_3] : memref<2x128x128xf32, #tpu.memory_space<vmem>>, vector<1x128x128xf32>
    %2 = vector.shape_cast %1 : vector<1x128x128xf32> to vector<128x128xf32>
    %cst = arith.constant dense<0.000000e+00> : vector<512x128xf32>
    %3 = tpu.matmul %0, %2, %cst {dimension_numbers = #tpu.dot_dimension_numbers<[1], [0], [0], [1], [0, 0, 1, 1], [], []>} : vector<512x128xf32>, vector<128x128xf32>, vector<512x128xf32> -> vector<512x128xf32>
    %cst_4 = arith.constant 0.000000e+00 : f32
    %4 = vector.broadcast %cst_4 : f32 to vector<512x128xf32>
    %5 = arith.maximumf %3, %4 : vector<512x128xf32>
    %6 = vector.shape_cast %5 : vector<512x128xf32> to vector<2x256x128xf32>
    %cst_5 = arith.constant dense<0.000000e+00> : vector<2x128xf32>
    %7 = vector.multi_reduction <add>, %6, %cst_5 [1] : vector<2x256x128xf32> to vector<2x128xf32>
    %c1 = arith.constant 1 : index
    %c0_6 = arith.constant 0 : index
    %c0_7 = arith.constant 0 : index
    %8 = vector.load %arg1[%c1, %c0_6, %c0_7] : memref<2x128x128xf32, #tpu.memory_space<vmem>>, vector<1x128x128xf32>
    %9 = vector.shape_cast %8 : vector<1x128x128xf32> to vector<128x128xf32>
    %cst_8 = arith.constant dense<0.000000e+00> : vector<2x128xf32>
    %10 = tpu.matmul %7, %9, %cst_8 {dimension_numbers = #tpu.dot_dimension_numbers<[1], [0], [0], [1], [0, 0, 1, 1], [], []>} : vector<2x128xf32>, vector<128x128xf32>, vector<2x128xf32> -> vector<2x128xf32>
    %c0_9 = arith.constant 0 : index
    %c0_10 = arith.constant 0 : index
    %11 = vector.load %arg2[%c0_9, %c0_10] : memref<2x128xf32, #tpu.memory_space<vmem>>, vector<2x128xf32>
    tpu.vector_store %arg2[%c0_9, %c0_10], %10 {strides = array<i32>} : memref<2x128xf32, #tpu.memory_space<vmem>>, vector<2x128xf32>,
    return
  }
}

</mosaic_0001>

<bundles_post_ra>
// kernel: tpu_custom_call.1
= control target key start
LH: loop header
LB: loop body
LE: loop exit
PB: predicated region body
PF: predicated region fallthrough
CT: control target
= control target key end

     0   :  { %7 = vsyncpa [#allocation3], 0  ;;  %s1313_s0 = inlined_call_operand.hbm [shape: f32[512,128], index: 0, kind: input, shape index: {}]   ;;  %s1314_s1 = inlined_call_operand.hbm [shape: f32[2,128,128], index: 1, kind: input, shape index: {}]   ;;  %s1315_s2 = inlined_call_operand.hbm [shape: f32[2,128], index: 2, kind: output, shape index: {}]  }
   0x1   :  { %8 = vsyncpa [#allocation6], 0 }
   0x2   :  { %9 = vsyncpa [#allocation4], 0  ;;  %s1164_s9 = smov [#allocation2]   ;;  %s1092_s13 = scalar_lea.hbm %s1313_s0, 8192 }
   0x3   :  { %s15_s10 = sshll.u32 %s1164_s9, 4  ;;  %p1093_p0 = scmp.ne.s32.totalorder %s1313_s0, %s1092_s13  ;;  %s16_s10 = int_to_ptr.vmem [resolvable:$true] %s15_s10 }
   0x4   :  { %p1096_p1 = scmp.lt.u32.totalorder %s1092_s13, %s1313_s0 }
   0x6   :  { %p1098_p2 = pnand %p1096_p1, %p1093_p0 }
   0x8   :  { %1101 = shalt.err (!%p1098_p2)
}
   0x9   :  { %s1102_s18 = scalar_lea.vmem %s16_s10, 8192  ;;  %p1107_p4 = scmp.lt.s32.totalorder %s16_s10, %s16_s10 }
   0xa   :  { %p1103_p3 = scmp.ne.s32.totalorder %s16_s10, %s1102_s18  ;;  %p1108_p5 = scmp.lt.s32.totalorder %s1102_s18, %s1102_s18 }
   0xc   :  { %p1109_p6 = por %p1108_p5, %p1107_p4 }
   0xe   :  { %p1110_p7 = pnand %p1109_p6, %p1103_p3 }
  0x10   :  { %1113 = shalt.err (!%p1110_p7)
}
  0x11   :  { %s1165_s19 = smov 128   ;;  %s1166_s20 = smov 8  }
  0x12   :  { %21 = dma.hbm_to_vmem [thread:$0]  %s1313_s0, 8192, %s16_s10, [#allocation3], %s1165_s19, %s1165_s19, %s1166_s20  }
  0x13   :  { %s1167_s23 = smov [#allocation5]   ;;  %s1114_s27 = scalar_lea.hbm %s1314_s1, 4096 }
  0x14   :  { %s27_s24 = sshll.u32 %s1167_s23, 4  ;;  %p1115_p8 = scmp.ne.s32.totalorder %s1314_s1, %s1114_s27  ;;  %s28_s24 = int_to_ptr.vmem [resolvable:$true] %s27_s24 }
  0x15   :  { %p1118_p9 = scmp.lt.u32.totalorder %s1114_s27, %s1314_s1 }
  0x17   :  { %p1120_p10 = pnand %p1118_p9, %p1115_p8 }
  0x19   :  { %1123 = shalt.err (!%p1120_p10)
}
  0x1a   :  { %s1124_s4 = scalar_lea.vmem %s28_s24, 4096  ;;  %p1129_p12 = scmp.lt.s32.totalorder %s28_s24, %s28_s24 }
  0x1b   :  { %p1125_p11 = scmp.ne.s32.totalorder %s28_s24, %s1124_s4  ;;  %p1130_p13 = scmp.lt.s32.totalorder %s1124_s4, %s1124_s4 }
  0x1d   :  { %p1131_p0 = por %p1130_p13, %p1129_p12 }
  0x1f   :  { %p1132_p1 = pnand %p1131_p0, %p1125_p11 }
  0x21   :  { %1135 = shalt.err (!%p1132_p1)
}
  0x22   :  { %33 = dma.hbm_to_vmem [thread:$0]  %s1314_s1, 4096, %s28_s24, [#allocation6], %s1165_s19, %s1165_s19, %s1166_s20  }
  0x23   :  { %1158 = dma.done.wait [#allocation3], 8192  }
  0x24   :  { %1159 = vsyncadd [#allocation3], 4294959104 }
  0x25   :  { %1160 = dma.done.wait [#allocation6], 4096  }
  0x26   :  { %1161 = vsyncadd [#allocation6], 4294963200  ;;  %v104_v0 = vld [vmem:[#allocation5] sm:$0xff]  ;;  %v105_v1 = vld [vmem:[#allocation5 + $0x8] sm:$0xff]  ;;  %vm1169_vm0 = vmmov 0   ;;  %vm662_vm1 = vcmask 1041409  }
  0x27   :  { %v106_v2 = vld [vmem:[#allocation5 + $0x10] sm:$0xff]  ;;  %v1012_v3 = vpack.c.bf16 %v105_v1, %v104_v0  ;;  %v107_v4 = vld [vmem:[#allocation5 + $0x18] sm:$0xff]  ;;  %v108_v6 = vld [vmem:[#allocation5 + $0x20] sm:$0xff]  ;;  %s1171_s1 = smov [#allocation7]  }
  0x28   :  { %v1016_v5 = vpack.c.bf16 %v107_v4, %v106_v2  ;;  %v109_v7 = vld [vmem:[#allocation5 + $0x28] sm:$0xff]  ;;  %v40_v9 = vld [vmem:[#allocation2] sm:$0xff]  ;;  %v110_v10 = vld [vmem:[#allocation5 + $0x30] sm:$0xff]  ;;  %s742_s6 = sshll.u32 %s1171_s1, 4  ;;  %s743_s6 = int_to_ptr.vmem [resolvable:$true] %s742_s6 }
  0x29   :  { %1013 = vmatprep.subr.bf16.mxu0 %v1012_v3  ;;  %1068 = vmatprep.subr.bf16.mxu1 %v1012_v3  ;;  %v1020_v8 = vpack.c.bf16 %v109_v7, %v108_v6  ;;  %v111_v11 = vld [vmem:[#allocation5 + $0x38] sm:$0xff]  ;;  %v112_v13 = vld [vmem:[#allocation5 + $0x40] sm:$0xff]  ;;  %v113_v14 = vld [vmem:[#allocation5 + $0x48] sm:$0xff]  ;;  %s1136_s7 = scalar_lea.vmem %s743_s6, 32  ;;  %p1141_p3 = scmp.lt.s32.totalorder %s743_s6, %s743_s6 }
  0x2a   :  { %1015 = vmatpush3.bf16.msra.mxu0 %v1012_v3  ;;  %1076 = vmatpush3.bf16.msra.mxu1 %v1012_v3  ;;  %v1024_v12 = vpack.c.bf16 %v111_v11, %v110_v10  ;;  %v1028_v15 = vpack.c.bf16 %v113_v14, %v112_v13  ;;  %v114_v16 = vld [vmem:[#allocation5 + $0x50] sm:$0xff]  ;;  %v115_v17 = vld [vmem:[#allocation5 + $0x58] sm:$0xff]  ;;  %v116_v20 = vld [vmem:[#allocation5 + $0x60] sm:$0xff]  ;;  %p1137_p2 = scmp.ne.s32.totalorder %s743_s6, %s1136_s7  ;;  %p1142_p4 = scmp.lt.s32.totalorder %s1136_s7, %s1136_s7 }
  0x2b   :  { %1017 = vmatprep.subr.bf16.mxu0 %v1016_v5  ;;  %1069 = vmatprep.subr.bf16.mxu1 %v1016_v5  ;;  %v74_v18 = vld [vmem:[#allocation2 + $0x110] sm:$0xff]  ;;  %v1032_v19 = vpack.c.bf16 %v115_v17, %v114_v16  ;;  %v117_v21 = vld [vmem:[#allocation5 + $0x68] sm:$0xff]  ;;  %v119_v24 = vld [vmem:[#allocation5 + $0x78] sm:$0xff] }
  0x2c   :  { %881 = vmatprep.mubr.f32.mxu0 %v40_v9  ;;  %932 = vmatprep.mubr.f32.mxu1 %v74_v18  ;;  %v1036_v22 = vpack.c.bf16 %v117_v21, %v116_v20  ;;  %v118_v23 = vld [vmem:[#allocation5 + $0x70] sm:$0xff]  ;;  %v41_v26 = vld [vmem:[#allocation2 + $0x8] sm:$0xff]  ;;  %v75_v27 = vld [vmem:[#allocation2 + $0x118] sm:$0xff]  ;;  %p1143_p5 = por %p1142_p4, %p1141_p3 }
  0x2d   :  { %v1040_v25 = vpack.c.bf16 %v119_v24, %v118_v23  ;;  %v42_v28 = vld [vmem:[#allocation2 + $0x10] sm:$0xff]  ;;  %v76_v29 = vld [vmem:[#allocation2 + $0x120] sm:$0xff]  ;;  %v43_v30 = vld [vmem:[#allocation2 + $0x18] sm:$0xff] }
  0x2e   :  { %1019 = vmatpush3.bf16.msra.mxu0 %v1016_v5  ;;  %1077 = vmatpush3.bf16.msra.mxu1 %v1016_v5  ;;  %v77_v31 = vld [vmem:[#allocation2 + $0x128] sm:$0xff]  ;;  %v44_v32 = vld [vmem:[#allocation2 + $0x20] sm:$0xff]  ;;  %v78_v33 = vld [vmem:[#allocation2 + $0x130] sm:$0xff]  ;;  %p1144_p6 = pnand %p1143_p5, %p1137_p2 }
  0x2f   :  { %1021 = vmatprep.subr.bf16.mxu0 %v1020_v8  ;;  %1070 = vmatprep.subr.bf16.mxu1 %v1020_v8  ;;  %v45_v34 = vld [vmem:[#allocation2 + $0x28] sm:$0xff]  ;;  %v79_v35 = vld [vmem:[#allocation2 + $0x138] sm:$0xff]  ;;  %v46_v36 = vld [vmem:[#allocation2 + $0x30] sm:$0xff] }
  0x30   :  { %v80_v37 = vld [vmem:[#allocation2 + $0x140] sm:$0xff]  ;;  %v47_v38 = vld [vmem:[#allocation2 + $0x38] sm:$0xff]  ;;  %v81_v39 = vld [vmem:[#allocation2 + $0x148] sm:$0xff] }
  0x31   :  { %v48_v40 = vld [vmem:[#allocation2 + $0x40] sm:$0xff]  ;;  %v82_v41 = vld [vmem:[#allocation2 + $0x150] sm:$0xff]  ;;  %v49_v42 = vld [vmem:[#allocation2 + $0x48] sm:$0xff] }
  0x32   :  { %1023 = vmatpush3.bf16.msra.mxu0 %v1020_v8  ;;  %1078 = vmatpush3.bf16.msra.mxu1 %v1020_v8  ;;  %v83_v43 = vld [vmem:[#allocation2 + $0x158] sm:$0xff]  ;;  %v50_v44 = vld [vmem:[#allocation2 + $0x50] sm:$0xff]  ;;  %v84_v45 = vld [vmem:[#allocation2 + $0x160] sm:$0xff] }
  0x33   :  { %1025 = vmatprep.subr.bf16.mxu0 %v1024_v12  ;;  %1071 = vmatprep.subr.bf16.mxu1 %v1024_v12  ;;  %v51_v46 = vld [vmem:[#allocation2 + $0x58] sm:$0xff]  ;;  %v85_v47 = vld [vmem:[#allocation2 + $0x168] sm:$0xff]  ;;  %v52_v48 = vld [vmem:[#allocation2 + $0x60] sm:$0xff] }
  0x34   :  { %v86_v49 = vld [vmem:[#allocation2 + $0x170] sm:$0xff]  ;;  %v53_v50 = vld [vmem:[#allocation2 + $0x68] sm:$0xff]  ;;  %v87_v51 = vld [vmem:[#allocation2 + $0x178] sm:$0xff] }
  0x35   :  { %v54_v52 = vld [vmem:[#allocation2 + $0x70] sm:$0xff]  ;;  %v88_v53 = vld [vmem:[#allocation2 + $0x180] sm:$0xff]  ;;  %v55_v54 = vld [vmem:[#allocation2 + $0x78] sm:$0xff] }
  0x36   :  { %1027 = vmatpush3.bf16.msra.mxu0 %v1024_v12  ;;  %1079 = vmatpush3.bf16.msra.mxu1 %v1024_v12  ;;  %v89_v55 = vld [vmem:[#allocation2 + $0x188] sm:$0xff]  ;;  %v56_v56 = vld [vmem:[#allocation2 + $0x80] sm:$0xff]  ;;  %v90_v57 = vld [vmem:[#allocation2 + $0x190] sm:$0xff] }
  0x37   :  { %1029 = vmatprep.subr.bf16.mxu0 %v1028_v15  ;;  %1072 = vmatprep.subr.bf16.mxu1 %v1028_v15  ;;  %v57_v58 = vld [vmem:[#allocation2 + $0x88] sm:$0xff]  ;;  %v91_v59 = vld [vmem:[#allocation2 + $0x198] sm:$0xff]  ;;  %v58_v60 = vld [vmem:[#allocation2 + $0x90] sm:$0xff] }
  0x38   :  { %v92_v61 = vld [vmem:[#allocation2 + $0x1a0] sm:$0xff]  ;;  %v59_v62 = vld [vmem:[#allocation2 + $0x98] sm:$0xff]  ;;  %v93_v63 = vld [vmem:[#allocation2 + $0x1a8] sm:$0xff] }
  0x39   :  { %v60_v0 = vld [vmem:[#allocation2 + $0xa0] sm:$0xff]  ;;  %v94_v1 = vld [vmem:[#allocation2 + $0x1b0] sm:$0xff]  ;;  %v61_v2 = vld [vmem:[#allocation2 + $0xa8] sm:$0xff] }
  0x3a   :  { %1031 = vmatpush3.bf16.msra.mxu0 %v1028_v15  ;;  %1080 = vmatpush3.bf16.msra.mxu1 %v1028_v15  ;;  %v95_v3 = vld [vmem:[#allocation2 + $0x1b8] sm:$0xff]  ;;  %v62_v4 = vld [vmem:[#allocation2 + $0xb0] sm:$0xff]  ;;  %v96_v5 = vld [vmem:[#allocation2 + $0x1c0] sm:$0xff] }
  0x3b   :  { %1033 = vmatprep.subr.bf16.mxu0 %v1032_v19  ;;  %1073 = vmatprep.subr.bf16.mxu1 %v1032_v19  ;;  %v63_v6 = vld [vmem:[#allocation2 + $0xb8] sm:$0xff]  ;;  %v97_v7 = vld [vmem:[#allocation2 + $0x1c8] sm:$0xff]  ;;  %v64_v8 = vld [vmem:[#allocation2 + $0xc0] sm:$0xff] }
  0x3c   :  { %v98_v9 = vld [vmem:[#allocation2 + $0x1d0] sm:$0xff]  ;;  %v65_v10 = vld [vmem:[#allocation2 + $0xc8] sm:$0xff]  ;;  %v99_v11 = vld [vmem:[#allocation2 + $0x1d8] sm:$0xff] }
  0x3d   :  { %v66_v12 = vld [vmem:[#allocation2 + $0xd0] sm:$0xff]  ;;  %v100_v13 = vld [vmem:[#allocation2 + $0x1e0] sm:$0xff]  ;;  %v67_v14 = vld [vmem:[#allocation2 + $0xd8] sm:$0xff] }
  0x3e   :  { %1035 = vmatpush3.bf16.msra.mxu0 %v1032_v19  ;;  %1081 = vmatpush3.bf16.msra.mxu1 %v1032_v19  ;;  %v101_v15 = vld [vmem:[#allocation2 + $0x1e8] sm:$0xff]  ;;  %v68_v16 = vld [vmem:[#allocation2 + $0xe0] sm:$0xff]  ;;  %v102_v17 = vld [vmem:[#allocation2 + $0x1f0] sm:$0xff] }
  0x3f   :  { %1037 = vmatprep.subr.bf16.mxu0 %v1036_v22  ;;  %1074 = vmatprep.subr.bf16.mxu1 %v1036_v22  ;;  %v69_v18 = vld [vmem:[#allocation2 + $0xe8] sm:$0xff]  ;;  %v103_v19 = vld [vmem:[#allocation2 + $0x1f8] sm:$0xff]  ;;  %v70_v20 = vld [vmem:[#allocation2 + $0xf0] sm:$0xff] }
  0x40   :  { %v71_v21 = vld [vmem:[#allocation2 + $0xf8] sm:$0xff]  ;;  %v73_v23 = vld [vmem:[#allocation2 + $0x108] sm:$0xff]  ;;  %v644_v24 = vld [vmem:[#allocation5 + $0x80] sm:$0xff] }
  0x42   :  { %1039 = vmatpush3.bf16.msra.mxu0 %v1036_v22  ;;  %1082 = vmatpush3.bf16.msra.mxu1 %v1036_v22  ;;  %v72_v22 = vld [vmem:[#allocation2 + $0x100] sm:$0xff] }
  0x43   :  { %1041 = vmatprep.subr.bf16.mxu0 %v1040_v25  ;;  %1075 = vmatprep.subr.bf16.mxu1 %v1040_v25 }
  0x46   :  { %1043 = vmatpush3.bf16.msra.mxu0 %v1040_v25  ;;  %1083 = vmatpush3.bf16.msra.mxu1 %v1040_v25  ;;  %v645_v25 = vld [vmem:[#allocation5 + $0x88] sm:$0xff] }
  0x49   :  { %882 = vmatmul.mubr.f32.vlgmr.msra.gmra.mrb[0].mxu0 %v41_v26  ;;  %933 = vmatmul.mubr.f32.vlgmr.msra.gmra.mrb[0].mxu1 %v75_v27  ;;  %v1168_v26 = vmov 0.0|0.0   ;;  %v1045_v27 = vpack.c.bf16 %v645_v25, %v644_v24 }
  0x4a   :  { %884 = vmatprep.mubr.f32.mxu0 %v42_v28  ;;  %935 = vmatprep.mubr.f32.mxu1 %v76_v29  ;;  %v646_v28 = vld [vmem:[#allocation5 + $0x90] sm:$0xff]  ;;  %v647_v29 = vld [vmem:[#allocation5 + $0x98] sm:$0xff] }
  0x4b   :  { %1044 = vmatprep.subr.bf16.mxu1 %v1168_v26 }
  0x4c   :  { %1046 = vmatpush3.bf16.msra.mxu1 %v1045_v27 }
  0x4d   :  { %885 = vmatmul.mubr.f32.gmra.mrb[2].mxu0 %v43_v30  ;;  %936 = vmatmul.mubr.f32.gmra.mrb[2].mxu1 %v77_v31  ;;  %v1048_v30 = vpack.c.bf16 %v647_v29, %v646_v28  ;;  %v648_v31 = vld [vmem:[#allocation5 + $0xa0] sm:$0xff] }
  0x4e   :  { %887 = vmatprep.mubr.f32.mxu0 %v44_v32  ;;  %938 = vmatprep.mubr.f32.mxu1 %v78_v33  ;;  %v649_v32 = vld [vmem:[#allocation5 + $0xa8] sm:$0xff] }
  0x4f   :  { %1047 = vmatprep.subr.bf16.mxu1 %v1168_v26  ;;  %v1051_v33 = vpack.c.bf16 %v649_v32, %v648_v31 }
  0x50   :  { %1049 = vmatpush3.bf16.msra.mxu1 %v1048_v30 }
  0x51   :  { %888 = vmatmul.mubr.f32.gmra.mrb[4].mxu0 %v45_v34  ;;  %939 = vmatmul.mubr.f32.gmra.mrb[4].mxu1 %v79_v35  ;;  %v650_v34 = vld [vmem:[#allocation5 + $0xb0] sm:$0xff]  ;;  %v651_v35 = vld [vmem:[#allocation5 + $0xb8] sm:$0xff] }
  0x52   :  { %890 = vmatprep.mubr.f32.mxu0 %v46_v36  ;;  %941 = vmatprep.mubr.f32.mxu1 %v80_v37  ;;  %v1054_v36 = vpack.c.bf16 %v651_v35, %v650_v34  ;;  %v652_v37 = vld [vmem:[#allocation5 + $0xc0] sm:$0xff] }
  0x53   :  { %1050 = vmatprep.subr.bf16.mxu1 %v1168_v26 }
  0x54   :  { %1052 = vmatpush3.bf16.msra.mxu1 %v1051_v33 }
  0x55   :  { %891 = vmatmul.mubr.f32.gmra.mrb[6].mxu0 %v47_v38  ;;  %942 = vmatmul.mubr.f32.gmra.mrb[6].mxu1 %v81_v39  ;;  %v653_v38 = vld [vmem:[#allocation5 + $0xc8] sm:$0xff] }
  0x56   :  { %893 = vmatprep.mubr.f32.mxu0 %v48_v40  ;;  %944 = vmatprep.mubr.f32.mxu1 %v82_v41  ;;  %v1057_v39 = vpack.c.bf16 %v653_v38, %v652_v37  ;;  %v654_v40 = vld [vmem:[#allocation5 + $0xd0] sm:$0xff]  ;;  %v655_v41 = vld [vmem:[#allocation5 + $0xd8] sm:$0xff] }
  0x57   :  { %1053 = vmatprep.subr.bf16.mxu1 %v1168_v26 }
  0x58   :  { %1055 = vmatpush3.bf16.msra.mxu1 %v1054_v36 }
  0x59   :  { %894 = vmatmul.mubr.f32.gmra.mrb[8].mxu0 %v49_v42  ;;  %945 = vmatmul.mubr.f32.gmra.mrb[8].mxu1 %v83_v43  ;;  %v1060_v42 = vpack.c.bf16 %v655_v41, %v654_v40 }
  0x5a   :  { %896 = vmatprep.mubr.f32.mxu0 %v50_v44  ;;  %947 = vmatprep.mubr.f32.mxu1 %v84_v45 }
  0x5b   :  { %1056 = vmatprep.subr.bf16.mxu1 %v1168_v26 }
  0x5c   :  { %1058 = vmatpush3.bf16.msra.mxu1 %v1057_v39 }
  0x5d   :  { %897 = vmatmul.mubr.f32.gmra.mrb[10].mxu0 %v51_v46  ;;  %948 = vmatmul.mubr.f32.gmra.mrb[10].mxu1 %v85_v47 }
  0x5e   :  { %899 = vmatprep.mubr.f32.mxu0 %v52_v48  ;;  %950 = vmatprep.mubr.f32.mxu1 %v86_v49 }
  0x5f   :  { %1059 = vmatprep.subr.bf16.mxu1 %v1168_v26 }
  0x60   :  { %1061 = vmatpush3.bf16.msra.mxu1 %v1060_v42 }
  0x61   :  { %900 = vmatmul.mubr.f32.gmra.mrb[12].mxu0 %v53_v50  ;;  %951 = vmatmul.mubr.f32.gmra.mrb[12].mxu1 %v87_v51 }
  0x62   :  { %902 = vmatprep.mubr.f32.mxu0 %v54_v52  ;;  %953 = vmatprep.mubr.f32.mxu1 %v88_v53 }
  0x63   :  { %1062 = vmatprep.subr.bf16.mxu1 %v1168_v26 }
  0x65   :  { %903 = vmatmul.mubr.f32.gmra.mrb[14].mxu0 %v55_v54  ;;  %954 = vmatmul.mubr.f32.gmra.mrb[14].mxu1 %v89_v55  ;;  %v656_v54 = vld [vmem:[#allocation5 + $0xe0] sm:$0xff]  ;;  %v657_v55 = vld [vmem:[#allocation5 + $0xe8] sm:$0xff] }
  0x66   :  { %905 = vmatprep.mubr.f32.mxu0 %v56_v56  ;;  %956 = vmatprep.mubr.f32.mxu1 %v90_v57  ;;  %v1063_v57 = vpack.c.bf16 %v657_v55, %v656_v54 }
  0x68   :  { %1064 = vmatpush3.bf16.msra.mxu1 %v1063_v57 }
  0x69   :  { %906 = vmatmul.mubr.f32.gmra.mrb[16].mxu0 %v57_v58  ;;  %957 = vmatmul.mubr.f32.gmra.mrb[16].mxu1 %v91_v59 }
  0x6a   :  { %908 = vmatprep.mubr.f32.mxu0 %v58_v60  ;;  %959 = vmatprep.mubr.f32.mxu1 %v92_v61 }
  0x6b   :  { %1065 = vmatprep.subr.bf16.mxu1 %v1168_v26 }
  0x6d   :  { %909 = vmatmul.mubr.f32.gmra.mrb[18].mxu0 %v59_v62  ;;  %960 = vmatmul.mubr.f32.gmra.mrb[18].mxu1 %v93_v63 }
  0x6e   :  { %911 = vmatprep.mubr.f32.mxu0 %v60_v0  ;;  %962 = vmatprep.mubr.f32.mxu1 %v94_v1  ;;  %v658_v0 = vld [vmem:[#allocation5 + $0xf0] sm:$0xff]  ;;  %v659_v1 = vld [vmem:[#allocation5 + $0xf8] sm:$0xff] }
  0x71   :  { %912 = vmatmul.mubr.f32.gmra.mrb[20].mxu0 %v61_v2  ;;  %963 = vmatmul.mubr.f32.gmra.mrb[20].mxu1 %v95_v3 }
  0x72   :  { %914 = vmatprep.mubr.f32.mxu0 %v62_v4  ;;  %965 = vmatprep.mubr.f32.mxu1 %v96_v5  ;;  %v1066_v4 = vpack.c.bf16 %v659_v1, %v658_v0 }
  0x74   :  { %1067 = vmatpush3.bf16.msra.mxu1 %v1066_v4 }
  0x75   :  { %915 = vmatmul.mubr.f32.gmra.mrb[22].mxu0 %v63_v6  ;;  %966 = vmatmul.mubr.f32.gmra.mrb[22].mxu1 %v97_v7 }
  0x76   :  { %917 = vmatprep.mubr.f32.mxu0 %v64_v8  ;;  %968 = vmatprep.mubr.f32.mxu1 %v98_v9  ;;  %v1170_v9 = vmov 0.0  }
  0x79   :  { %918 = vmatmul.mubr.f32.gmra.mrb[24].mxu0 %v65_v10  ;;  %969 = vmatmul.mubr.f32.gmra.mrb[24].mxu1 %v99_v11 }
  0x7a   :  { %920 = vmatprep.mubr.f32.mxu0 %v66_v12  ;;  %971 = vmatprep.mubr.f32.mxu1 %v100_v13 }
  0x7d   :  { %921 = vmatmul.mubr.f32.gmra.mrb[26].mxu0 %v67_v14  ;;  %972 = vmatmul.mubr.f32.gmra.mrb[26].mxu1 %v101_v15 }
  0x7e   :  { %923 = vmatprep.mubr.f32.mxu0 %v68_v16  ;;  %974 = vmatprep.mubr.f32.mxu1 %v102_v17 }
  0x81   :  { %924 = vmatmul.mubr.f32.gmra.mrb[28].mxu0 %v69_v18  ;;  %975 = vmatmul.mubr.f32.gmra.mrb[28].mxu1 %v103_v19 }
  0x82   :  { %926 = vmatprep.mubr.f32.mxu0 %v70_v20  ;;  %1009 = vmatprep.mubr.msk.f32.mxu1 %vm1169_vm0, %v1170_v9 }
  0x85   :  { %927 = vmatmul.mubr.f32.gmra.mrb[30].mxu0 %v71_v21 }
  0x86   :  { %929 = vmatprep.mubr.f32.mxu0 %v72_v22 }
  0x89   :  { %930 = vmatmul.mubr.f32.gmra.mrb[32].mxu0 %v73_v23 }
 0x11c   :  { %v883_v43 = vpop.f32.mrb[0].mxu0  ;;  %v1211_v44 = vpop.f32.mrb[0].mxu1 }
 0x11d   :  { %v506_v45 = vmax.f32 %v883_v43, 0.0  ;;  %v186_v46 = vpop.f32.mrb[1].mxu0  ;;  %v1213_v47 = vpop.f32.mrb[1].mxu1 }
 0x11e   :  { %v505_v48 = vmax.f32 %v186_v46, 0.0 }
 0x120   :  { %v569_v49 = vadd.f32 %v506_v45, %v505_v48  ;;  %v886_v50 = vpop.f32.mrb[2].mxu0  ;;  %v1215_v51 = vpop.f32.mrb[2].mxu1 }
 0x121   :  { %v196_v52 = vpop.f32.mrb[3].mxu0  ;;  %v1217_v53 = vpop.f32.mrb[3].mxu1  ;;  %v508_v58 = vmax.f32 %v886_v50, 0.0 }
 0x122   :  { %v507_v56 = vmax.f32 %v196_v52, 0.0 }
 0x124   :  { %v570_v59 = vadd.f32 %v569_v49, %v507_v56  ;;  %v889_v60 = vpop.f32.mrb[4].mxu0  ;;  %v1219_v61 = vpop.f32.mrb[4].mxu1 }
 0x125   :  { %v206_v62 = vpop.f32.mrb[5].mxu0  ;;  %v1221_v63 = vpop.f32.mrb[5].mxu1  ;;  %v510_v5 = vmax.f32 %v889_v60, 0.0 }
 0x126   :  { %v509_v2 = vmax.f32 %v206_v62, 0.0  ;;  %v571_v3 = vadd.f32 %v570_v59, %v508_v58 }
 0x128   :  { %v572_v6 = vadd.f32 %v571_v3, %v509_v2  ;;  %v892_v7 = vpop.f32.mrb[6].mxu0  ;;  %v1223_v8 = vpop.f32.mrb[6].mxu1 }
 0x129   :  { %v216_v10 = vpop.f32.mrb[7].mxu0  ;;  %v1225_v11 = vpop.f32.mrb[7].mxu1  ;;  %v512_v14 = vmax.f32 %v892_v7, 0.0 }
 0x12a   :  { %v511_v12 = vmax.f32 %v216_v10, 0.0  ;;  %v573_v13 = vadd.f32 %v572_v6, %v510_v5 }
 0x12c   :  { %v574_v15 = vadd.f32 %v573_v13, %v511_v12  ;;  %v895_v16 = vpop.f32.mrb[8].mxu0  ;;  %v1227_v17 = vpop.f32.mrb[8].mxu1 }
 0x12d   :  { %v226_v18 = vpop.f32.mrb[9].mxu0  ;;  %v1229_v19 = vpop.f32.mrb[9].mxu1  ;;  %v514_v22 = vmax.f32 %v895_v16, 0.0 }
 0x12e   :  { %v513_v20 = vmax.f32 %v226_v18, 0.0  ;;  %v575_v21 = vadd.f32 %v574_v15, %v512_v14 }
 0x130   :  { %v576_v23 = vadd.f32 %v575_v21, %v513_v20  ;;  %v898_v24 = vpop.f32.mrb[10].mxu0  ;;  %v1231_v25 = vpop.f32.mrb[10].mxu1 }
 0x131   :  { %v236_v26 = vpop.f32.mrb[11].mxu0  ;;  %v1233_v27 = vpop.f32.mrb[11].mxu1  ;;  %v516_v30 = vmax.f32 %v898_v24, 0.0 }
 0x132   :  { %v515_v28 = vmax.f32 %v236_v26, 0.0  ;;  %v577_v29 = vadd.f32 %v576_v23, %v514_v22 }
 0x134   :  { %v578_v31 = vadd.f32 %v577_v29, %v515_v28  ;;  %v901_v32 = vpop.f32.mrb[12].mxu0  ;;  %v1235_v33 = vpop.f32.mrb[12].mxu1 }
 0x135   :  { %v246_v34 = vpop.f32.mrb[13].mxu0  ;;  %v1237_v35 = vpop.f32.mrb[13].mxu1  ;;  %v518_v38 = vmax.f32 %v901_v32, 0.0 }
 0x136   :  { %v517_v36 = vmax.f32 %v246_v34, 0.0  ;;  %v579_v37 = vadd.f32 %v578_v31, %v516_v30 }
 0x138   :  { %v580_v39 = vadd.f32 %v579_v37, %v517_v36  ;;  %v904_v40 = vpop.f32.mrb[14].mxu0  ;;  %v1239_v41 = vpop.f32.mrb[14].mxu1 }
 0x139   :  { %v256_v42 = vpop.f32.mrb[15].mxu0  ;;  %v1241_v43 = vpop.f32.mrb[15].mxu1  ;;  %v520_v48 = vmax.f32 %v904_v40, 0.0 }
 0x13a   :  { %v519_v45 = vmax.f32 %v256_v42, 0.0  ;;  %v581_v46 = vadd.f32 %v580_v39, %v518_v38 }
 0x13c   :  { %v582_v49 = vadd.f32 %v581_v46, %v519_v45  ;;  %v907_v50 = vpop.f32.mrb[16].mxu0  ;;  %v1243_v52 = vpop.f32.mrb[16].mxu1 }
 0x13d   :  { %v266_v54 = vpop.f32.mrb[17].mxu0  ;;  %v1245_v55 = vpop.f32.mrb[17].mxu1  ;;  %v522_v58 = vmax.f32 %v907_v50, 0.0 }
 0x13e   :  { %v521_v56 = vmax.f32 %v266_v54, 0.0  ;;  %v583_v57 = vadd.f32 %v582_v49, %v520_v48 }
 0x140   :  { %v584_v59 = vadd.f32 %v583_v57, %v521_v56  ;;  %v910_v60 = vpop.f32.mrb[18].mxu0  ;;  %v1247_v62 = vpop.f32.mrb[18].mxu1 }
 0x141   :  { %v276_v0 = vpop.f32.mrb[19].mxu0  ;;  %v1249_v1 = vpop.f32.mrb[19].mxu1  ;;  %v524_v4 = vmax.f32 %v910_v60, 0.0 }
 0x142   :  { %v523_v2 = vmax.f32 %v276_v0, 0.0  ;;  %v585_v3 = vadd.f32 %v584_v59, %v522_v58 }
 0x144   :  { %v586_v5 = vadd.f32 %v585_v3, %v523_v2  ;;  %v913_v6 = vpop.f32.mrb[20].mxu0  ;;  %v1251_v7 = vpop.f32.mrb[20].mxu1 }
 0x145   :  { %v286_v9 = vpop.f32.mrb[21].mxu0  ;;  %v1253_v10 = vpop.f32.mrb[21].mxu1  ;;  %v526_v14 = vmax.f32 %v913_v6, 0.0 }
 0x146   :  { %v525_v12 = vmax.f32 %v286_v9, 0.0  ;;  %v587_v13 = vadd.f32 %v586_v5, %v524_v4 }
 0x148   :  { %v588_v15 = vadd.f32 %v587_v13, %v525_v12  ;;  %v916_v16 = vpop.f32.mrb[22].mxu0  ;;  %v1255_v18 = vpop.f32.mrb[22].mxu1 }
 0x149   :  { %v296_v20 = vpop.f32.mrb[23].mxu0  ;;  %v1257_v21 = vpop.f32.mrb[23].mxu1  ;;  %v528_v24 = vmax.f32 %v916_v16, 0.0 }
 0x14a   :  { %v527_v22 = vmax.f32 %v296_v20, 0.0  ;;  %v589_v23 = vadd.f32 %v588_v15, %v526_v14  ;;  %v539_v20 = vmax.f32 %v1213_v47, 0.0  ;;  %v546_v47 = vmax.f32 %v1223_v8, 0.0 }
 0x14b   :  { %v553_v8 = vmax.f32 %v1241_v43, 0.0  ;;  %v560_v43 = vmax.f32 %v1251_v7, 0.0 }
 0x14c   :  { %v590_v26 = vadd.f32 %v589_v23, %v527_v22  ;;  %v919_v28 = vpop.f32.mrb[24].mxu0  ;;  %v1259_v29 = vpop.f32.mrb[24].mxu1  ;;  %v540_v23 = vmax.f32 %v1211_v44, 0.0  ;;  %v547_v44 = vmax.f32 %v1229_v19, 0.0  ;;  %v554_v19 = vmax.f32 %v1239_v41, 0.0 }
 0x14d   :  { %v306_v30 = vpop.f32.mrb[25].mxu0  ;;  %v1261_v31 = vpop.f32.mrb[25].mxu1  ;;  %v530_v36 = vmax.f32 %v919_v28, 0.0  ;;  %v561_v41 = vmax.f32 %v1257_v21, 0.0 }
 0x14e   :  { %v529_v32 = vmax.f32 %v306_v30, 0.0  ;;  %v591_v34 = vadd.f32 %v590_v26, %v528_v24  ;;  %v541_v26 = vmax.f32 %v1217_v53, 0.0  ;;  %v542_v30 = vmax.f32 %v1215_v51, 0.0 }
 0x14f   :  { %v548_v53 = vmax.f32 %v1227_v17, 0.0  ;;  %v549_v51 = vmax.f32 %v1233_v27, 0.0  ;;  %v555_v17 = vmax.f32 %v1245_v55, 0.0  ;;  %v556_v27 = vmax.f32 %v1243_v52, 0.0 }
 0x150   :  { %v592_v37 = vadd.f32 %v591_v34, %v529_v32  ;;  %v922_v38 = vpop.f32.mrb[26].mxu0  ;;  %v1263_v39 = vpop.f32.mrb[26].mxu1  ;;  %v543_v34 = vmax.f32 %v1221_v63, 0.0  ;;  %v550_v63 = vmax.f32 %v1231_v25, 0.0  ;;  %v557_v25 = vmax.f32 %v1249_v1, 0.0 }
 0x151   :  { %v316_v40 = vpop.f32.mrb[27].mxu0  ;;  %v1265_v42 = vpop.f32.mrb[27].mxu1  ;;  %v532_v48 = vmax.f32 %v922_v38, 0.0  ;;  %v562_v55 = vmax.f32 %v1255_v18, 0.0  ;;  %v563_v52 = vmax.f32 %v1261_v31, 0.0  ;;  %v564_v1 = vmax.f32 %v1259_v29, 0.0 }
 0x152   :  { %v531_v45 = vmax.f32 %v316_v40, 0.0  ;;  %v593_v46 = vadd.f32 %v592_v37, %v530_v36  ;;  %v544_v37 = vmax.f32 %v1219_v61, 0.0  ;;  %v545_v40 = vmax.f32 %v1225_v11, 0.0 }
 0x153   :  { %v551_v61 = vmax.f32 %v1237_v35, 0.0  ;;  %v552_v11 = vmax.f32 %v1235_v33, 0.0  ;;  %v558_v35 = vmax.f32 %v1247_v62, 0.0  ;;  %v559_v33 = vmax.f32 %v1253_v10, 0.0 }
 0x154   :  { %v594_v49 = vadd.f32 %v593_v46, %v531_v45  ;;  %v925_v50 = vpop.f32.mrb[28].mxu0  ;;  %v1267_v54 = vpop.f32.mrb[28].mxu1  ;;  %v565_v62 = vmax.f32 %v1265_v42, 0.0 }
 0x155   :  { %v326_v56 = vpop.f32.mrb[29].mxu0  ;;  %v1269_v57 = vpop.f32.mrb[29].mxu1  ;;  %v534_v60 = vmax.f32 %v925_v50, 0.0  ;;  %v568_v18 = vmax.f32 %v1267_v54, 0.0 }
 0x156   :  { %v533_v58 = vmax.f32 %v326_v56, 0.0  ;;  %v595_v59 = vadd.f32 %v594_v49, %v532_v48 }
 0x158   :  { %v596_v0 = vadd.f32 %v595_v59, %v533_v58  ;;  %v928_v2 = vpop.f32.mrb[30].mxu0 }
 0x159   :  { %v336_v3 = vpop.f32.mrb[31].mxu0  ;;  %v536_v6 = vmax.f32 %v928_v2, 0.0 }
 0x15a   :  { %v535_v4 = vmax.f32 %v336_v3, 0.0  ;;  %v597_v5 = vadd.f32 %v596_v0, %v534_v60 }
 0x15c   :  { %v598_v9 = vadd.f32 %v597_v5, %v535_v4  ;;  %v931_v12 = vpop.f32.mrb[32].mxu0 }
 0x15d   :  { %v538_v13 = vmax.f32 %v931_v12, 0.0  ;;  %v346_v14 = vpop.f32.mrb[33].mxu0 }
 0x15e   :  { %v599_v15 = vadd.f32 %v598_v9, %v536_v6  ;;  %v537_v16 = vmax.f32 %v346_v14, 0.0 }
 0x160   :  { %v606_v22 = vadd.f32 %v538_v13, %v537_v16 }
 0x162   :  { %v607_v24 = vadd.f32 %v606_v22, %v539_v20  ;;  %v600_v20 = vrot.slane %v599_v15, 4  ;;  %v566_v22 = vmax.f32 %v1263_v39, 0.0 }
 0x164   :  { %v608_v28 = vadd.f32 %v607_v24, %v540_v23  ;;  %v567_v23 = vmax.f32 %v1269_v57, 0.0  ;;  %v601_v21 = vadd.f32 %v600_v20, %v599_v15 }
 0x166   :  { %v609_v32 = vadd.f32 %v608_v28, %v541_v26  ;;  %v602_v28 = vrot.slane %v601_v21, 2 }
 0x168   :  { %v610_v36 = vadd.f32 %v609_v32, %v542_v30  ;;  %v603_v32 = vadd.f32 %v602_v28, %v601_v21 }
 0x16a   :  { %v611_v38 = vadd.f32 %v610_v36, %v543_v34  ;;  %v604_v36 = vrot.slane %v603_v32, 1 }
 0x16c   :  { %v612_v45 = vadd.f32 %v611_v38, %v544_v37  ;;  %v605_v38 = vadd.f32 %v604_v36, %v603_v32 }
 0x16e   :  { %v613_v46 = vadd.f32 %v612_v45, %v545_v40 }
 0x170   :  { %v614_v48 = vadd.f32 %v613_v46, %v546_v47 }
 0x172   :  { %v615_v49 = vadd.f32 %v614_v48, %v547_v44 }
 0x174   :  { %v616_v50 = vadd.f32 %v615_v49, %v548_v53 }
 0x176   :  { %v617_v56 = vadd.f32 %v616_v50, %v549_v51 }
 0x178   :  { %v618_v58 = vadd.f32 %v617_v56, %v550_v63 }
 0x17a   :  { %v619_v59 = vadd.f32 %v618_v58, %v551_v61 }
 0x17c   :  { %v620_v60 = vadd.f32 %v619_v59, %v552_v11 }
 0x17e   :  { %v621_v0 = vadd.f32 %v620_v60, %v553_v8 }
 0x180   :  { %v622_v2 = vadd.f32 %v621_v0, %v554_v19 }
 0x182   :  { %v623_v3 = vadd.f32 %v622_v2, %v555_v17 }
 0x184   :  { %v624_v4 = vadd.f32 %v623_v3, %v556_v27 }
 0x186   :  { %v625_v5 = vadd.f32 %v624_v4, %v557_v25 }
 0x188   :  { %v626_v6 = vadd.f32 %v625_v5, %v558_v35 }
 0x18a   :  { %v627_v9 = vadd.f32 %v626_v6, %v559_v33 }
 0x18c   :  { %v628_v12 = vadd.f32 %v627_v9, %v560_v43 }
 0x18e   :  { %v629_v13 = vadd.f32 %v628_v12, %v561_v41 }
 0x190   :  { %v630_v14 = vadd.f32 %v629_v13, %v562_v55 }
 0x192   :  { %v631_v16 = vadd.f32 %v630_v14, %v563_v52 }
 0x194   :  { %v632_v10 = vadd.f32 %v631_v16, %v564_v1 }
 0x196   :  { %v633_v7 = vadd.f32 %v632_v10, %v565_v62 }
 0x198   :  { %v634_v24 = vadd.f32 %v633_v7, %v566_v22 }
 0x19a   :  { %v635_v26 = vadd.f32 %v634_v24, %v567_v23 }
 0x19c   :  { %v636_v31 = vadd.f32 %v635_v26, %v568_v18 }
 0x19e   :  { %v637_v30 = vrot.slane %v636_v31, 4 }
 0x1a0   :  { %v638_v29 = vadd.f32 %v637_v30, %v636_v31 }
 0x1a2   :  { %v639_v34 = vrot.slane %v638_v29, 2 }
 0x1a4   :  { %v640_v42 = vadd.f32 %v639_v34, %v638_v29 }
 0x1a6   :  { %v641_v37 = vrot.slane %v640_v42, 1 }
 0x1a8   :  { %v642_v39 = vadd.f32 %v641_v37, %v640_v42 }
 0x1aa   :  { %v663_v40 = vsel %vm662_vm1, %v642_v39, %v605_v38 }
 0x1ab   :  { %1010 = vmatmul.mubr.f32.vlgmr.msra.gmra.mrb[30].mxu1 %v663_v40 }
 0x27e   :  { %v731_v57 = vpop.f32.mrb[30].mxu1 }
 0x27f   :  { %735 = vst [vmem:[#allocation7] sm:$0x3] %v731_v57  ;;  %v1011_v54 = vpop.f32.mrb[31].mxu1 }
 0x280   :  { %1147 = shalt.err (!%p1144_p6)
}
 0x281   :  { %s1148_s10 = scalar_lea.hbm %s1315_s2, 32 }
 0x282   :  { %p1149_p7 = scmp.ne.s32.totalorder %s1315_s2, %s1148_s10  ;;  %p1152_p8 = scmp.lt.u32.totalorder %s1148_s10, %s1315_s2 }
 0x284   :  { %p1154_p9 = pnand %p1152_p8, %p1149_p7 }
 0x286   :  { %1157 = shalt.err (!%p1154_p9)
}
 0x287   :  { %745 = dma.vmem_to_hbm [thread:$0]  %s743_s6, 32, %s1315_s2, [#allocation4]  }
 0x288   :  { %1162 = dma.done.wait [#allocation4], 32  }
 0x289   :  { %1163 = vsyncadd [#allocation4], 4294967264 }
 0x28a   :  { %749 = vsyncpa [#allocation3], 1 }
 0x28b   :  { %750 = vsyncpa [#allocation6], 1 }
 0x28c   :  { %751 = vsyncpa [#allocation4], 1 }

</bundles_post_ra>
